<compile_context>
chip_gen: v7x
topology: tpu7x:2x2x1
jax: 0.10.0
libtpu: 0.0.40
codegen_flags: <defaults>
</compile_context>

<pallas_src>
import jax
import jax.numpy as jnp
from jax.experimental import pallas as pl
from jax.experimental.pallas import tpu as pltpu


def _round_up(x, m):
    return ((x + m - 1) // m) * m


def _choose_block(B, block_b=1024):
    """Batch tile: multiple of 128 (lane-dense transposed output, sublane-aligned
    input), minimizing padding waste, preferring >=2 grid steps (v7x megacore),
    then the largest tile (amortize per-step overhead)."""
    if B <= 128:
        return 128
    cands = sorted({c for c in (128, 256, 512, block_b // 2, block_b) if c >= 128})

    def key(c):
        padded = _round_up(B, c)
        steps = padded // c
        return (padded - B,                 # least padding waste
                0 if steps >= 2 else 1,     # prefer >=2 steps (v7x: 2 TCs)
                -c)                         # then biggest tile

    return min(cands, key=key)


def _block_diag(w, n):
    """(Din, Dout) -> (n*Din, n*Dout) block-diagonal with n copies of w."""
    din, dout = w.shape
    eye = jnp.eye(n, dtype=w.dtype)
    return (eye[:, None, :, None] * w[None, :, None, :]).reshape(n * din, n * dout)


def mixer_kernel(x_ref, w1_ref, b1_ref, w2_ref, b2_ref, w3_ref, b3_ref,
                 w4t_ref, b4t_ref, o_ref):
    """One grid step = one batch tile (bt rows).

    x_ref  : (bt, A*Din)       compute dtype (f32 or bf16), lane-dense
    w1_ref : (A*Din, A*mid1)   block-diag psi layer 1
    b1_ref : (1, A*mid1)       f32 (tiled psi bias 1)
    w2_ref : (A*mid1, H)       stacked psi layer 2 (agent sum folded in)
    b2_ref : (1, H)            f32 (= A * psi bias 2)
    w3_ref : (H, mid2)         phi layer 1
    b3_ref : (1, mid2)         f32
    w4t_ref: (Dout, mid2)      phi layer 2, pre-transposed
    b4t_ref: (Dout, 1)         f32
    o_ref  : (Dout, bt)        f32, transposed output (batch along lanes)
    """
    cdt = w1_ref.dtype

    # psi layer 1: one matmul over all (batch * agents) features via block-diag W1
    h1 = jnp.dot(x_ref[...], w1_ref[...],
                 preferred_element_type=jnp.float32) + b1_ref[...]
    h1 = jnp.maximum(h1, 0.0)                                   # ReLU in f32

    # psi layer 2 with the agent sum folded in:
    #   sum_a(h1_a @ W2 + b2) == h1_flat @ tile(W2,(A,1)) + A*b2
    s = jnp.dot(h1.astype(cdt), w2_ref[...],
                preferred_element_type=jnp.float32) + b2_ref[...]

    # phi layer 1
    g1 = jnp.dot(s.astype(cdt), w3_ref[...],
                 preferred_element_type=jnp.float32) + b3_ref[...]
    g1 = jnp.maximum(g1, 0.0)                                   # ReLU in f32

    # phi layer 2, produced directly in transposed (Dout, bt) layout so the
    # output store is a full unmasked (8,128) tile:  out_t = W4^T . g1^T
    out_t = jax.lax.dot_general(
        w4t_ref[...], g1.astype(cdt),
        dimension_numbers=(((1,), (1,)), ((), ())),
        preferred_element_type=jnp.float32) + b4t_ref[...]

    o_ref[...] = out_t.astype(o_ref.dtype)


def mixer_forward(x, params, *, block_b=1024, compute_dtype=jnp.float32):
    """x: (B, A, Din).  params: dict of psi/phi weights & biases (f32).

    Returns (B, Dout) float32.  Matches the torch Mixer forward up to fp
    reassociation of the agent sum (folded into the psi-2 matmul)."""
    B, A, Din = x.shape
    w1, b1 = params["psi_w1"], params["psi_b1"]
    w2, b2 = params["psi_w2"], params["psi_b2"]
    w3, b3 = params["phi_w1"], params["phi_b1"]
    w4, b4 = params["phi_w2"], params["phi_b2"]
    mid1, H = w1.shape[1], w2.shape[1]
    mid2, Dout = w3.shape[1], w4.shape[1]

    # ---- wrapper-side weight restructuring (tiny, done once per call) ----
    w1bd = _block_diag(w1, A).astype(compute_dtype)         # (A*Din, A*mid1)
    b1t = jnp.tile(b1, (1, A)).astype(jnp.float32)          # (1, A*mid1)
    w2s = jnp.tile(w2, (A, 1)).astype(compute_dtype)        # (A*mid1, H)
    b2s = (A * b2).astype(jnp.float32)                      # (1, H)
    w3c = w3.astype(compute_dtype)                          # (H, mid2)
    b3c = b3.astype(jnp.float32)                            # (1, mid2)
    w4t = w4.T.astype(compute_dtype)                        # (Dout, mid2)
    b4t = b4.T.astype(jnp.float32)                          # (Dout, 1)

    # ---- lane-dense input: contiguous (free) reshape to (B, A*Din) ----
    AD = A * Din
    x2 = x.reshape(B, AD).astype(compute_dtype)

    # ---- batch tiling ----
    bt = _choose_block(B, block_b)
    B_pad = _round_up(B, bt)
    if B_pad != B:
        x2 = jnp.pad(x2, ((0, B_pad - B), (0, 0)))
    grid = (B_pad // bt,)

    # grid-invariant operands: whole array resident in VMEM (no double-buffering)
    resident = pl.BlockSpec(memory_space=pltpu.MemorySpace.VMEM)

    itemsize = jnp.dtype(compute_dtype).itemsize
    n_weight_bytes = itemsize * (w1bd.size + w2s.size + w3c.size + w4t.size) + \
        4 * (b1t.size + b2s.size + b3c.size + b4t.size)
    cost = pl.CostEstimate(
        flops=2 * B_pad * (AD * A * mid1 + A * mid1 * H + H * mid2 + mid2 * Dout),
        transcendentals=0,
        bytes_accessed=itemsize * B_pad * AD + n_weight_bytes + 4 * B_pad * Dout,
    )

    out_t = pl.pallas_call(
        mixer_kernel,
        out_shape=jax.ShapeDtypeStruct((Dout, B_pad), jnp.float32),
        grid=grid,
        in_specs=[
            pl.BlockSpec((bt, AD), lambda b: (b, 0)),        # lane-dense x tile
            resident, resident, resident, resident,
            resident, resident, resident, resident,
        ],
        out_specs=pl.BlockSpec((Dout, bt), lambda b: (0, b)),  # lane-dense output
        compiler_params=pltpu.CompilerParams(
            dimension_semantics=("parallel",)),
        cost_estimate=cost,
    )(x2, w1bd, b1t, w2s, b2s, w3c, b3c, w4t, b4t)

    # tiny wrapper-side layout plumbing: (Dout, B) -> (B, Dout)
    return out_t[:, :B].T


def init_params(key, input_dim, hidden_dim, output_dim, midmult=1.0):
    mid1 = int(round(midmult * (input_dim + hidden_dim) / 2))
    mid2 = int(round(midmult * (hidden_dim + output_dim) / 2))
    ks = jax.random.split(key, 8)

    def lin(kw, kb, fan_in, fan_out):
        bound = 1.0 / jnp.sqrt(jnp.float32(fan_in))
        w = jax.random.uniform(kw, (fan_in, fan_out), jnp.float32, -bound, bound)
        b = jax.random.uniform(kb, (1, fan_out), jnp.float32, -bound, bound)
        return w, b

    psi_w1, psi_b1 = lin(ks[0], ks[1], input_dim, mid1)
    psi_w2, psi_b2 = lin(ks[2], ks[3], mid1, hidden_dim)
    phi_w1, phi_b1 = lin(ks[4], ks[5], hidden_dim, mid2)
    phi_w2, phi_b2 = lin(ks[6], ks[7], mid2, output_dim)
    return dict(psi_w1=psi_w1, psi_b1=psi_b1, psi_w2=psi_w2, psi_b2=psi_b2,
                phi_w1=phi_w1, phi_b1=phi_b1, phi_w2=phi_w2, phi_b2=phi_b2)


def mixer_reference(x, p):
    """Pure-JAX reference mirroring the torch forward pass."""
    h = jnp.maximum(x @ p["psi_w1"] + p["psi_b1"][0], 0.0)
    local = h @ p["psi_w2"] + p["psi_b2"][0]            # (B, A, H)
    s = local.sum(axis=-2)                              # (B, H)
    g = jnp.maximum(s @ p["phi_w1"] + p["phi_b1"][0], 0.0)
    return g @ p["phi_w2"] + p["phi_b2"][0]             # (B, Dout)


if __name__ == "__main__":
    key = jax.random.PRNGKey(0)
    k_x, k_p, k_xl = jax.random.split(key, 3)

    batch, n_agents = 2, 8
    input_dim, hidden_dim, output_dim = 16, 32, 8

    x = jax.random.normal(k_x, (batch, n_agents, input_dim), jnp.float32)
    params = init_params(k_p, input_dim, hidden_dim, output_dim, midmult=1.0)
    ref = mixer_reference(x, params)

    # f32 path (tight check; differs from reference only by fp reassociation)
    out = jax.block_until_ready(mixer_forward(x, params, compute_dtype=jnp.float32))
    assert out.shape == (batch, output_dim), out.shape
    assert jnp.allclose(out, ref, atol=1e-4, rtol=1e-4), (
        f"f32 max abs err = {jnp.max(jnp.abs(out - ref))}")

    # bf16-input path (f32 accumulation/elementwise), loose check
    out_bf = jax.block_until_ready(mixer_forward(x, params, compute_dtype=jnp.bfloat16))
    assert out_bf.shape == (batch, output_dim), out_bf.shape
    assert jnp.allclose(out_bf, ref, atol=1e-1, rtol=5e-2), (
        f"bf16 max abs err = {jnp.max(jnp.abs(out_bf - ref))}")

    # larger batch: exercises padding + multi-step grid
    xl = jax.random.normal(k_xl, (300, n_agents, input_dim), jnp.float32)
    refl = mixer_reference(xl, params)
    outl = jax.block_until_ready(mixer_forward(xl, params, compute_dtype=jnp.float32))
    assert outl.shape == (300, output_dim), outl.shape
    assert jnp.allclose(outl, refl, atol=1e-4, rtol=1e-4), (
        f"large-batch max abs err = {jnp.max(jnp.abs(outl - refl))}")

    print("KERNEL_OK")
</pallas_src>

<mosaic_0001>
module attributes {stable_mosaic.version = 11 : i64} {
  func.func @mixer_kernel(%arg0: i32, %arg1: memref<128x128xf32, #tpu.memory_space<vmem>>, %arg2: memref<128x192xf32, #tpu.memory_space<vmem>>, %arg3: memref<1x192xf32, #tpu.memory_space<vmem>>, %arg4: memref<192x32xf32, #tpu.memory_space<vmem>>, %arg5: memref<1x32xf32, #tpu.memory_space<vmem>>, %arg6: memref<32x20xf32, #tpu.memory_space<vmem>>, %arg7: memref<1x20xf32, #tpu.memory_space<vmem>>, %arg8: memref<8x20xf32, #tpu.memory_space<vmem>>, %arg9: memref<8x1xf32, #tpu.memory_space<vmem>>, %arg10: memref<8x128xf32, #tpu.memory_space<vmem>>) attributes {dimension_semantics = [#tpu.dimension_semantics<parallel>], iteration_bounds = array<i64: 1>, scalar_prefetch = 0 : i64, scratch_operands = 0 : i64, tpu.core_type = #tpu.core_type<tc>, window_params = [{transform_indices = @transform_0, window_bounds = array<i64: 128, 128>}, {pipeline_mode = #tpu.pipeline_mode<synchronous>, transform_indices = @transform_1, window_bounds = array<i64: 128, 192>}, {pipeline_mode = #tpu.pipeline_mode<synchronous>, transform_indices = @transform_2, window_bounds = array<i64: 1, 192>}, {pipeline_mode = #tpu.pipeline_mode<synchronous>, transform_indices = @transform_3, window_bounds = array<i64: 192, 32>}, {pipeline_mode = #tpu.pipeline_mode<synchronous>, transform_indices = @transform_4, window_bounds = array<i64: 1, 32>}, {pipeline_mode = #tpu.pipeline_mode<synchronous>, transform_indices = @transform_5, window_bounds = array<i64: 32, 20>}, {pipeline_mode = #tpu.pipeline_mode<synchronous>, transform_indices = @transform_6, window_bounds = array<i64: 1, 20>}, {pipeline_mode = #tpu.pipeline_mode<synchronous>, transform_indices = @transform_7, window_bounds = array<i64: 8, 20>}, {pipeline_mode = #tpu.pipeline_mode<synchronous>, transform_indices = @transform_8, window_bounds = array<i64: 8, 1>}, {transform_indices = @transform_9, window_bounds = array<i64: 8, 128>}]} {
    %c0 = arith.constant 0 : index
    %c0_0 = arith.constant 0 : index
    %0 = vector.load %arg1[%c0, %c0_0] : memref<128x128xf32, #tpu.memory_space<vmem>>, vector<128x128xf32>
    %c0_1 = arith.constant 0 : index
    %c0_2 = arith.constant 0 : index
    %1 = vector.load %arg2[%c0_1, %c0_2] : memref<128x192xf32, #tpu.memory_space<vmem>>, vector<128x192xf32>
    %cst = arith.constant dense<0.000000e+00> : vector<128x192xf32>
    %2 = tpu.matmul %0, %1, %cst {dimension_numbers = #tpu.dot_dimension_numbers<[1], [0], [0], [1], [0, 0, 1, 1], [], []>} : vector<128x128xf32>, vector<128x192xf32>, vector<128x192xf32> -> vector<128x192xf32>
    %c0_3 = arith.constant 0 : index
    %c0_4 = arith.constant 0 : index
    %3 = vector.load %arg3[%c0_3, %c0_4] : memref<1x192xf32, #tpu.memory_space<vmem>>, vector<1x192xf32>
    %4 = vector.broadcast %3 : vector<1x192xf32> to vector<128x192xf32>
    %5 = arith.addf %2, %4 : vector<128x192xf32>
    %cst_5 = arith.constant 0.000000e+00 : f32
    %6 = vector.broadcast %cst_5 : f32 to vector<128x192xf32>
    %7 = arith.maximumf %5, %6 : vector<128x192xf32>
    %c0_6 = arith.constant 0 : index
    %c0_7 = arith.constant 0 : index
    %8 = vector.load %arg4[%c0_6, %c0_7] : memref<192x32xf32, #tpu.memory_space<vmem>>, vector<192x32xf32>
    %cst_8 = arith.constant dense<0.000000e+00> : vector<128x32xf32>
    %9 = tpu.matmul %7, %8, %cst_8 {dimension_numbers = #tpu.dot_dimension_numbers<[1], [0], [0], [1], [0, 0, 1, 1], [], []>} : vector<128x192xf32>, vector<192x32xf32>, vector<128x32xf32> -> vector<128x32xf32>
    %c0_9 = arith.constant 0 : index
    %c0_10 = arith.constant 0 : index
    %10 = vector.load %arg5[%c0_9, %c0_10] : memref<1x32xf32, #tpu.memory_space<vmem>>, vector<1x32xf32>
    %11 = vector.broadcast %10 : vector<1x32xf32> to vector<128x32xf32>
    %12 = arith.addf %9, %11 : vector<128x32xf32>
    %c0_11 = arith.constant 0 : index
    %c0_12 = arith.constant 0 : index
    %13 = vector.load %arg6[%c0_11, %c0_12] : memref<32x20xf32, #tpu.memory_space<vmem>>, vector<32x20xf32>
    %cst_13 = arith.constant dense<0.000000e+00> : vector<128x20xf32>
    %14 = tpu.matmul %12, %13, %cst_13 {dimension_numbers = #tpu.dot_dimension_numbers<[1], [0], [0], [1], [0, 0, 1, 1], [], []>} : vector<128x32xf32>, vector<32x20xf32>, vector<128x20xf32> -> vector<128x20xf32>
    %c0_14 = arith.constant 0 : index
    %c0_15 = arith.constant 0 : index
    %15 = vector.load %arg7[%c0_14, %c0_15] : memref<1x20xf32, #tpu.memory_space<vmem>>, vector<1x20xf32>
    %16 = vector.broadcast %15 : vector<1x20xf32> to vector<128x20xf32>
    %17 = arith.addf %14, %16 : vector<128x20xf32>
    %cst_16 = arith.constant 0.000000e+00 : f32
    %18 = vector.broadcast %cst_16 : f32 to vector<128x20xf32>
    %19 = arith.maximumf %17, %18 : vector<128x20xf32>
    %c0_17 = arith.constant 0 : index
    %c0_18 = arith.constant 0 : index
    %20 = vector.load %arg8[%c0_17, %c0_18] : memref<8x20xf32, #tpu.memory_space<vmem>>, vector<8x20xf32>
    %cst_19 = arith.constant dense<0.000000e+00> : vector<8x128xf32>
    %21 = tpu.matmul %20, %19, %cst_19 {dimension_numbers = #tpu.dot_dimension_numbers<[1], [1], [0], [0], [0, 0, 1, 0], [], []>} : vector<8x20xf32>, vector<128x20xf32>, vector<8x128xf32> -> vector<8x128xf32>
    %c0_20 = arith.constant 0 : index
    %c0_21 = arith.constant 0 : index
    %22 = vector.load %arg9[%c0_20, %c0_21] : memref<8x1xf32, #tpu.memory_space<vmem>>, vector<8x1xf32>
    %23 = vector.broadcast %22 : vector<8x1xf32> to vector<8x128xf32>
    %24 = arith.addf %21, %23 : vector<8x128xf32>
    %c0_22 = arith.constant 0 : index
    %c0_23 = arith.constant 0 : index
    %25 = vector.load %arg10[%c0_22, %c0_23] : memref<8x128xf32, #tpu.memory_space<vmem>>, vector<8x128xf32>
    tpu.vector_store %arg10[%c0_22, %c0_23], %24 {strides = array<i32>} : memref<8x128xf32, #tpu.memory_space<vmem>>, vector<8x128xf32>,
    return
  }
  func.func @transform_0(%arg0: i32) -> (i32, i32) {
    %c0_i32 = arith.constant 0 : i32
    %c0_i32_0 = arith.constant 0 : i32
    return %arg0, %c0_i32 : i32, i32
  }
  func.func @transform_1(%arg0: i32) -> (i32, i32) {
    %c0_i32 = arith.constant 0 : i32
    %c0_i32_0 = arith.constant 0 : i32
    %c0_i32_1 = arith.constant 0 : i32
    return %c0_i32, %c0_i32_0 : i32, i32
  }
  func.func @transform_2(%arg0: i32) -> (i32, i32) {
    %c0_i32 = arith.constant 0 : i32
    %c0_i32_0 = arith.constant 0 : i32
    %c0_i32_1 = arith.constant 0 : i32
    return %c0_i32, %c0_i32_0 : i32, i32
  }
  func.func @transform_3(%arg0: i32) -> (i32, i32) {
    %c0_i32 = arith.constant 0 : i32
    %c0_i32_0 = arith.constant 0 : i32
    %c0_i32_1 = arith.constant 0 : i32
    return %c0_i32, %c0_i32_0 : i32, i32
  }
  func.func @transform_4(%arg0: i32) -> (i32, i32) {
    %c0_i32 = arith.constant 0 : i32
    %c0_i32_0 = arith.constant 0 : i32
    %c0_i32_1 = arith.constant 0 : i32
    return %c0_i32, %c0_i32_0 : i32, i32
  }
  func.func @transform_5(%arg0: i32) -> (i32, i32) {
    %c0_i32 = arith.constant 0 : i32
    %c0_i32_0 = arith.constant 0 : i32
    %c0_i32_1 = arith.constant 0 : i32
    return %c0_i32, %c0_i32_0 : i32, i32
  }
  func.func @transform_6(%arg0: i32) -> (i32, i32) {
    %c0_i32 = arith.constant 0 : i32
    %c0_i32_0 = arith.constant 0 : i32
    %c0_i32_1 = arith.constant 0 : i32
    return %c0_i32, %c0_i32_0 : i32, i32
  }
  func.func @transform_7(%arg0: i32) -> (i32, i32) {
    %c0_i32 = arith.constant 0 : i32
    %c0_i32_0 = arith.constant 0 : i32
    %c0_i32_1 = arith.constant 0 : i32
    return %c0_i32, %c0_i32_0 : i32, i32
  }
  func.func @transform_8(%arg0: i32) -> (i32, i32) {
    %c0_i32 = arith.constant 0 : i32
    %c0_i32_0 = arith.constant 0 : i32
    %c0_i32_1 = arith.constant 0 : i32
    return %c0_i32, %c0_i32_0 : i32, i32
  }
  func.func @transform_9(%arg0: i32) -> (i32, i32) {
    %c0_i32 = arith.constant 0 : i32
    %c0_i32_0 = arith.constant 0 : i32
    return %c0_i32, %arg0 : i32, i32
  }
}

</mosaic_0001>

<bundles_post_ra>
// kernel: tpu_custom_call.1
= control target key start
LH: loop header
LB: loop body
LE: loop exit
PB: predicated region body
PF: predicated region fallthrough
CT: control target
= control target key end

     0   :  { %v1169_v7 = vmov 0.0   ;;  %v1170_v8 = vmov 0.0|0.0   ;;  %s1643_s0 = inlined_call_operand.vmem [shape: f32[128,128], index: 0, kind: input, shape index: {}]   ;;  %s1644_s1 = inlined_call_operand.vmem [shape: f32[128,192], index: 1, kind: input, shape index: {}]   ;;  %s1645_s2 = inlined_call_operand.vmem [shape: f32[1,192], index: 2, kind: input, shape index: {}]   ;;  %s1646_s3 = inlined_call_operand.vmem [shape: f32[192,32], index: 3, kind: input, shape index: {}]   ;;  %s1647_s4 = inlined_call_operand.vmem [shape: f32[1,32], index: 4, kind: input, shape index: {}]   ;;  %s1648_s5 = inlined_call_operand.vmem [shape: f32[32,20], index: 5, kind: input, shape index: {}]   ;;  %s1649_s6 = inlined_call_operand.vmem [shape: f32[1,20], index: 6, kind: input, shape index: {}]   ;;  %s1650_s7 = inlined_call_operand.vmem [shape: f32[8,20], index: 7, kind: input, shape index: {}]   ;;  %s1651_s8 = inlined_call_operand.vmem [shape: f32[8,1], index: 8, kind: input, shape index: {}]   ;;  %s1652_s9 = inlined_call_operand.hbm [shape: f32[8,128], index: 9, kind: output, shape index: {}]  }
   0x1   :  { %v50_v0 = vld [vmem:[%s1644_s1 + $0x8] sm:$0xff]  ;;  %v52_v1 = vld [vmem:[%s1644_s1 + $0x18] sm:$0xff]  ;;  %v49_v2 = vld [vmem:[%s1644_s1] sm:$0xff]  ;;  %157 = vmatprep.mubr.f32.mxu0 %v1169_v7  ;;  %1063 = vmatprep.subr.bf16.mxu1 %v1170_v8 }
   0x2   :  { %v1031_v3 = vpack.c.bf16 %v52_v1, %v50_v0  ;;  %v51_v4 = vld [vmem:[%s1644_s1 + $0x10] sm:$0xff]  ;;  %v54_v5 = vld [vmem:[%s1644_s1 + $0x28] sm:$0xff]  ;;  %v56_v6 = vld [vmem:[%s1644_s1 + $0x38] sm:$0xff] }
   0x3   :  { %v1033_v9 = vpack.c.bf16 %v51_v4, %v49_v2  ;;  %v1035_v10 = vpack.c.bf16 %v56_v6, %v54_v5  ;;  %v53_v11 = vld [vmem:[%s1644_s1 + $0x20] sm:$0xff]  ;;  %v55_v12 = vld [vmem:[%s1644_s1 + $0x30] sm:$0xff]  ;;  %v58_v13 = vld [vmem:[%s1644_s1 + $0x48] sm:$0xff] }
   0x4   :  { %1032 = vmatprep.subr.bf16.mxu0 %v1031_v3  ;;  %v60_v14 = vld [vmem:[%s1644_s1 + $0x58] sm:$0xff]  ;;  %v1037_v15 = vpack.c.bf16 %v55_v12, %v53_v11  ;;  %v57_v17 = vld [vmem:[%s1644_s1 + $0x40] sm:$0xff]  ;;  %v59_v18 = vld [vmem:[%s1644_s1 + $0x50] sm:$0xff] }
   0x5   :  { %1034 = vmatpush1.bf16.msra.mxu0 %v1033_v9  ;;  %v1039_v16 = vpack.c.bf16 %v60_v14, %v58_v13  ;;  %v62_v19 = vld [vmem:[%s1644_s1 + $0x68] sm:$0xff]  ;;  %v64_v20 = vld [vmem:[%s1644_s1 + $0x78] sm:$0xff]  ;;  %v1041_v21 = vpack.c.bf16 %v59_v18, %v57_v17  ;;  %v61_v23 = vld [vmem:[%s1644_s1 + $0x60] sm:$0xff] }
   0x6   :  { %1036 = vmatprep.subr.bf16.mxu0 %v1035_v10  ;;  %v1043_v22 = vpack.c.bf16 %v64_v20, %v62_v19  ;;  %v63_v24 = vld [vmem:[%s1644_s1 + $0x70] sm:$0xff]  ;;  %v66_v25 = vld [vmem:[%s1644_s1 + $0x88] sm:$0xff]  ;;  %v68_v26 = vld [vmem:[%s1644_s1 + $0x98] sm:$0xff] }
   0x7   :  { %v1045_v27 = vpack.c.bf16 %v63_v24, %v61_v23  ;;  %v1047_v28 = vpack.c.bf16 %v68_v26, %v66_v25  ;;  %v65_v29 = vld [vmem:[%s1644_s1 + $0x80] sm:$0xff]  ;;  %v67_v30 = vld [vmem:[%s1644_s1 + $0x90] sm:$0xff]  ;;  %v70_v31 = vld [vmem:[%s1644_s1 + $0xa8] sm:$0xff] }
   0x8   :  { %v72_v32 = vld [vmem:[%s1644_s1 + $0xb8] sm:$0xff]  ;;  %v1049_v33 = vpack.c.bf16 %v67_v30, %v65_v29  ;;  %v286_v34 = vld [vmem:[%s1646_s3] sm:$0xff]  ;;  %v287_v35 = vld [vmem:[%s1646_s3 + $0x8] sm:$0xff] }
   0x9   :  { %1038 = vmatpush1.bf16.msra.mxu0 %v1037_v15  ;;  %v288_v36 = vld [vmem:[%s1646_s3 + $0x10] sm:$0xff]  ;;  %v1051_v37 = vpack.c.bf16 %v72_v32, %v70_v31  ;;  %v69_v38 = vld [vmem:[%s1644_s1 + $0xa0] sm:$0xff]  ;;  %v1064_v40 = vpack.c.bf16 %v287_v35, %v286_v34  ;;  %v289_v41 = vld [vmem:[%s1646_s3 + $0x18] sm:$0xff] }
   0xa   :  { %1040 = vmatprep.subr.bf16.mxu0 %v1039_v16  ;;  %v71_v39 = vld [vmem:[%s1644_s1 + $0xb0] sm:$0xff]  ;;  %v74_v42 = vld [vmem:[%s1644_s1 + $0xc8] sm:$0xff]  ;;  %v76_v43 = vld [vmem:[%s1644_s1 + $0xd8] sm:$0xff]  ;;  %v1067_v44 = vpack.c.bf16 %v289_v41, %v288_v36 }
   0xb   :  { %1065 = vmatpush1.bf16.msra.mxu1 %v1064_v40  ;;  %v1053_v45 = vpack.c.bf16 %v71_v39, %v69_v38  ;;  %v290_v46 = vld [vmem:[%s1646_s3 + $0x20] sm:$0xff]  ;;  %v291_v47 = vld [vmem:[%s1646_s3 + $0x28] sm:$0xff]  ;;  %v1055_v48 = vpack.c.bf16 %v76_v43, %v74_v42  ;;  %v75_v50 = vld [vmem:[%s1644_s1 + $0xd0] sm:$0xff] }
   0xc   :  { %1066 = vmatprep.subr.bf16.mxu1 %v1170_v8  ;;  %v73_v49 = vld [vmem:[%s1644_s1 + $0xc0] sm:$0xff]  ;;  %v78_v51 = vld [vmem:[%s1644_s1 + $0xe8] sm:$0xff]  ;;  %v80_v52 = vld [vmem:[%s1644_s1 + $0xf8] sm:$0xff]  ;;  %v1070_v53 = vpack.c.bf16 %v291_v47, %v290_v46 }
   0xd   :  { %1042 = vmatpush1.bf16.msra.mxu0 %v1041_v21 }
   0xe   :  { %1044 = vmatprep.subr.bf16.mxu0 %v1043_v22 }
   0xf   :  { %1068 = vmatpush1.bf16.msra.mxu1 %v1067_v44 }
  0x11   :  { %1046 = vmatpush1.bf16.msra.mxu0 %v1045_v27 }
  0x12   :  { %1048 = vmatprep.subr.bf16.mxu0 %v1047_v28 }
  0x15   :  { %1050 = vmatpush1.bf16.msra.mxu0 %v1049_v33 }
  0x16   :  { %1052 = vmatprep.subr.bf16.mxu0 %v1051_v37 }
  0x17   :  { %14 = vsyncpa [#allocation3], 0  ;;  %v1057_v54 = vpack.c.bf16 %v75_v50, %v73_v49  ;;  %1069 = vmatprep.subr.bf16.mxu1 %v1170_v8  ;;  %v292_v55 = vld [vmem:[%s1646_s3 + $0x30] sm:$0xff]  ;;  %v293_v56 = vld [vmem:[%s1646_s3 + $0x38] sm:$0xff]  ;;  %v1059_v57 = vpack.c.bf16 %v80_v52, %v78_v51  ;;  %v83_v46 = vlaneseq  ;;  %vm317_vm0 = vcmask 523264   ;;  %s1173_s13 = smov [#allocation2]  }
  0x18   :  { %v77_v58 = vld [vmem:[%s1644_s1 + $0xe0] sm:$0xff]  ;;  %v79_v59 = vld [vmem:[%s1644_s1 + $0xf0] sm:$0xff]  ;;  %1071 = vmatpush1.bf16.msra.mxu1 %v1070_v53  ;;  %v1073_v60 = vpack.c.bf16 %v293_v56, %v292_v55  ;;  %v295_v63 = vld [vmem:[%s1646_s3 + $0x48] sm:$0xff]  ;;  %vm522_vm1 = vcmask 261120   ;;  %vm1171_vm2 = vmmov 0   ;;  %vm739_vm3 = vcmask 162816  }
  0x19   :  { %1054 = vmatpush1.bf16.msra.mxu0 %v1053_v45  ;;  %v1061_v61 = vpack.c.bf16 %v79_v59, %v77_v58  ;;  %1072 = vmatprep.subr.bf16.mxu1 %v1170_v8  ;;  %v294_v62 = vld [vmem:[%s1646_s3 + $0x40] sm:$0xff]  ;;  %v296_v2 = vld [vmem:[%s1646_s3 + $0x50] sm:$0xff]  ;;  %v297_v3 = vld [vmem:[%s1646_s3 + $0x58] sm:$0xff]  ;;  %v84_v47 = vshrl.u32 %v83_v46, 7  ;;  %s868_s14 = sshll.u32 %s1173_s13, 4  ;;  %s869_s14 = int_to_ptr.vmem [resolvable:$true] %s868_s14 }
  0x1a   :  { %1056 = vmatprep.subr.bf16.mxu0 %v1055_v48  ;;  %v1076_v0 = vpack.c.bf16 %v295_v63, %v294_v62  ;;  %v33_v1 = vld [vmem:[%s1643_s0] sm:$0xff]  ;;  %v1079_v4 = vpack.c.bf16 %v297_v3, %v296_v2  ;;  %v34_v5 = vld [vmem:[%s1643_s0 + $0x8] sm:$0xff]  ;;  %v35_v11 = vld [vmem:[%s1643_s0 + $0x10] sm:$0xff]  ;;  %s1145_s15 = scalar_lea.vmem %s869_s14, 128  ;;  %p1150_p1 = scmp.lt.s32.totalorder %s869_s14, %s869_s14 }
  0x1b   :  { %v298_v6 = vld [vmem:[%s1646_s3 + $0x60] sm:$0xff]  ;;  %v299_v9 = vld [vmem:[%s1646_s3 + $0x68] sm:$0xff]  ;;  %v300_v12 = vld [vmem:[%s1646_s3 + $0x70] sm:$0xff]  ;;  %v85_v48 = vsub.s32 0, %v84_v47  ;;  %v89_v50 = vsub.s32 1, %v84_v47  ;;  %p1146_p0 = scmp.ne.s32.totalorder %s869_s14, %s1145_s15  ;;  %p1151_p2 = scmp.lt.s32.totalorder %s1145_s15, %s1145_s15 }
  0x1c   :  { %1074 = vmatpush1.bf16.msra.mxu1 %v1073_v60  ;;  %v1082_v10 = vpack.c.bf16 %v299_v9, %v298_v6  ;;  %v301_v13 = vld [vmem:[%s1646_s3 + $0x78] sm:$0xff]  ;;  %v302_v16 = vld [vmem:[%s1646_s3 + $0x80] sm:$0xff]  ;;  %v303_v17 = vld [vmem:[%s1646_s3 + $0x88] sm:$0xff] }
  0x1d   :  { %1058 = vmatpush1.bf16.msra.mxu0 %v1057_v54  ;;  %1075 = vmatprep.subr.bf16.mxu1 %v1170_v8  ;;  %v1085_v14 = vpack.c.bf16 %v301_v13, %v300_v12  ;;  %v36_v15 = vld [vmem:[%s1643_s0 + $0x18] sm:$0xff]  ;;  %v1088_v18 = vpack.c.bf16 %v303_v17, %v302_v16  ;;  %v37_v19 = vld [vmem:[%s1643_s0 + $0x20] sm:$0xff]  ;;  %v304_v20 = vld [vmem:[%s1646_s3 + $0x90] sm:$0xff]  ;;  %p1152_p3 = por %p1151_p2, %p1150_p1 }
  0x1e   :  { %1060 = vmatprep.subr.bf16.mxu0 %v1059_v57  ;;  %v305_v21 = vld [vmem:[%s1646_s3 + $0x98] sm:$0xff]  ;;  %v38_v23 = vld [vmem:[%s1643_s0 + $0x28] sm:$0xff]  ;;  %v39_v24 = vld [vmem:[%s1643_s0 + $0x30] sm:$0xff] }
  0x1f   :  { %v1091_v22 = vpack.c.bf16 %v305_v21, %v304_v20  ;;  %v40_v25 = vld [vmem:[%s1643_s0 + $0x38] sm:$0xff]  ;;  %v41_v26 = vld [vmem:[%s1643_s0 + $0x40] sm:$0xff]  ;;  %v42_v27 = vld [vmem:[%s1643_s0 + $0x48] sm:$0xff]  ;;  %p1153_p4 = pnand %p1152_p3, %p1146_p0 }
  0x20   :  { %1077 = vmatpush1.bf16.msra.mxu1 %v1076_v0  ;;  %v43_v28 = vld [vmem:[%s1643_s0 + $0x50] sm:$0xff]  ;;  %v44_v29 = vld [vmem:[%s1643_s0 + $0x58] sm:$0xff]  ;;  %v45_v30 = vld [vmem:[%s1643_s0 + $0x60] sm:$0xff] }
  0x21   :  { %1062 = vmatpush1.bf16.msra.mxu0 %v1061_v61  ;;  %1078 = vmatprep.subr.bf16.mxu1 %v1170_v8  ;;  %v46_v31 = vld [vmem:[%s1643_s0 + $0x68] sm:$0xff]  ;;  %v47_v32 = vld [vmem:[%s1643_s0 + $0x70] sm:$0xff]  ;;  %v48_v33 = vld [vmem:[%s1643_s0 + $0x78] sm:$0xff] }
  0x22   :  { %v306_v34 = vld [vmem:[%s1646_s3 + $0xa0] sm:$0xff]  ;;  %v307_v35 = vld [vmem:[%s1646_s3 + $0xa8] sm:$0xff]  ;;  %v308_v37 = vld [vmem:[%s1646_s3 + $0xb0] sm:$0xff] }
  0x23   :  { %v1094_v36 = vpack.c.bf16 %v307_v35, %v306_v34  ;;  %v309_v38 = vld [vmem:[%s1646_s3 + $0xb8] sm:$0xff]  ;;  %v511_v40 = vld [vmem:[%s1648_s5] sm:$0xff]  ;;  %v512_v41 = vld [vmem:[%s1648_s5 + $0x8] sm:$0xff] }
  0x24   :  { %158 = vmatmul.mubr.f32.vlgmr.msra.gmra.mrb[0].mxu0 %v33_v1  ;;  %1080 = vmatpush1.bf16.msra.mxu1 %v1079_v4  ;;  %v1097_v39 = vpack.c.bf16 %v309_v38, %v308_v37  ;;  %v513_v42 = vld [vmem:[%s1648_s5 + $0x10] sm:$0xff]  ;;  %v1099_v43 = vpack.c.bf16 %v512_v41, %v511_v40  ;;  %v514_v44 = vld [vmem:[%s1648_s5 + $0x18] sm:$0xff]  ;;  %v81_v49 = vld [vmem:[%s1645_s2] sm:$0x3] }
  0x25   :  { %163 = vmatprep.mubr.f32.mxu0 %v1169_v7  ;;  %1081 = vmatprep.subr.bf16.mxu1 %v1170_v8  ;;  %v1103_v45 = vpack.c.bf16 %v514_v44, %v513_v42  ;;  %v1484_v51 = vrot.slane %v81_v49, %v85_v48  ;;  %v1486_v52 = vrot.slane %v81_v49, %v89_v50  ;;  %vm1586_vm4 = vmpackc.low %vm739_vm3, %vm739_vm3 }
  0x26   :  { %1100 = vmatprep.subr.bf16.mxu0 %v1099_v43 }
  0x27   :  { %1102 = vmatpush3.bf16.msra.mxu0 %v1099_v43 }
  0x28   :  { %164 = vmatmul.mubr.f32.gmra.mrb[2].mxu0 %v34_v5  ;;  %1083 = vmatpush1.bf16.msra.mxu1 %v1082_v10 }
  0x29   :  { %169 = vmatprep.mubr.f32.mxu0 %v1169_v7  ;;  %1084 = vmatprep.subr.bf16.mxu1 %v1170_v8 }
  0x2a   :  { %1104 = vmatprep.subr.bf16.mxu0 %v1103_v45 }
  0x2b   :  { %1106 = vmatpush3.bf16.msra.mxu0 %v1103_v45 }
  0x2c   :  { %170 = vmatmul.mubr.f32.gmra.mrb[4].mxu0 %v35_v11  ;;  %1086 = vmatpush1.bf16.msra.mxu1 %v1085_v14 }
  0x2d   :  { %175 = vmatprep.mubr.f32.mxu0 %v1169_v7  ;;  %1087 = vmatprep.subr.bf16.mxu1 %v1170_v8 }
  0x30   :  { %176 = vmatmul.mubr.f32.gmra.mrb[6].mxu0 %v36_v15  ;;  %1089 = vmatpush1.bf16.msra.mxu1 %v1088_v18 }
  0x31   :  { %181 = vmatprep.mubr.f32.mxu0 %v1169_v7  ;;  %1090 = vmatprep.subr.bf16.mxu1 %v1170_v8 }
  0x34   :  { %182 = vmatmul.mubr.f32.gmra.mrb[8].mxu0 %v37_v19  ;;  %1092 = vmatpush1.bf16.msra.mxu1 %v1091_v22 }
  0x35   :  { %187 = vmatprep.mubr.f32.mxu0 %v1169_v7  ;;  %1093 = vmatprep.subr.bf16.mxu1 %v1170_v8 }
  0x38   :  { %188 = vmatmul.mubr.f32.gmra.mrb[10].mxu0 %v38_v23  ;;  %1095 = vmatpush1.bf16.msra.mxu1 %v1094_v36 }
  0x39   :  { %193 = vmatprep.mubr.f32.mxu0 %v1169_v7  ;;  %1096 = vmatprep.subr.bf16.mxu1 %v1170_v8 }
  0x3c   :  { %194 = vmatmul.mubr.f32.gmra.mrb[12].mxu0 %v39_v24  ;;  %1098 = vmatpush1.bf16.msra.mxu1 %v1097_v39 }
  0x3d   :  { %199 = vmatprep.mubr.f32.mxu0 %v1169_v7  ;;  %1107 = vmatprep.subr.bf16.mxu1 %v1170_v8 }
  0x40   :  { %200 = vmatmul.mubr.f32.gmra.mrb[14].mxu0 %v40_v25 }
  0x41   :  { %205 = vmatprep.mubr.f32.mxu0 %v1169_v7 }
  0x44   :  { %206 = vmatmul.mubr.f32.gmra.mrb[16].mxu0 %v41_v26 }
  0x45   :  { %211 = vmatprep.mubr.f32.mxu0 %v1169_v7 }
  0x48   :  { %212 = vmatmul.mubr.f32.gmra.mrb[18].mxu0 %v42_v27 }
  0x49   :  { %217 = vmatprep.mubr.f32.mxu0 %v1169_v7 }
  0x4c   :  { %218 = vmatmul.mubr.f32.gmra.mrb[20].mxu0 %v43_v28 }
  0x4d   :  { %223 = vmatprep.mubr.f32.mxu0 %v1169_v7 }
  0x50   :  { %224 = vmatmul.mubr.f32.gmra.mrb[22].mxu0 %v44_v29 }
  0x51   :  { %229 = vmatprep.mubr.f32.mxu0 %v1169_v7 }
  0x54   :  { %230 = vmatmul.mubr.f32.gmra.mrb[24].mxu0 %v45_v30 }
  0x55   :  { %235 = vmatprep.mubr.f32.mxu0 %v1169_v7 }
  0x58   :  { %236 = vmatmul.mubr.f32.gmra.mrb[26].mxu0 %v46_v31 }
  0x59   :  { %241 = vmatprep.mubr.f32.mxu0 %v1169_v7 }
  0x5c   :  { %242 = vmatmul.mubr.f32.gmra.mrb[28].mxu0 %v47_v32 }
  0x5d   :  { %247 = vmatprep.mubr.f32.mxu0 %v1169_v7 }
  0x60   :  { %248 = vmatmul.mubr.f32.gmra.mrb[30].mxu0 %v48_v33 }
  0xf7   :  { %v159_v53 = vpop.f32.mrb[0].mxu0 }
  0xf8   :  { %v160_v54 = vadd.f32 %v159_v53, %v1484_v51  ;;  %v161_v55 = vpop.f32.mrb[1].mxu0 }
  0xf9   :  { %v162_v56 = vadd.f32 %v161_v55, %v1486_v52 }
  0xfa   :  { %v254_v59 = vmax.f32 %v160_v54, 0.0 }
  0xfb   :  { %v255_v57 = vmax.f32 %v162_v56, 0.0  ;;  %v165_v58 = vpop.f32.mrb[2].mxu0 }
  0xfc   :  { %v166_v60 = vadd.f32 %v165_v58, %v1484_v51  ;;  %v167_v61 = vpop.f32.mrb[3].mxu0 }
  0xfd   :  { %v168_v62 = vadd.f32 %v167_v61, %v1486_v52  ;;  %877 = vmatprep.mubr.msk.f32.mxu1 %vm317_vm0, %v255_v57 }
  0xfe   :  { %431 = vmatmul.mubr.f32.vlgmr.msra.gmra.mrb[0].mxu1 %v254_v59  ;;  %v256_v1 = vmax.f32 %v166_v60, 0.0 }
  0xff   :  { %v257_v63 = vmax.f32 %v168_v62, 0.0  ;;  %v171_v0 = vpop.f32.mrb[4].mxu0 }
 0x100   :  { %v172_v2 = vadd.f32 %v171_v0, %v1484_v51  ;;  %v173_v3 = vpop.f32.mrb[5].mxu0 }
 0x101   :  { %v174_v4 = vadd.f32 %v173_v3, %v1486_v52  ;;  %878 = vmatprep.mubr.msk.f32.mxu1 %vm317_vm0, %v257_v63 }
 0x102   :  { %436 = vmatmul.mubr.f32.gmra.mrb[2].mxu1 %v256_v1  ;;  %v258_v9 = vmax.f32 %v172_v2, 0.0 }
 0x103   :  { %v259_v5 = vmax.f32 %v174_v4, 0.0  ;;  %v177_v6 = vpop.f32.mrb[6].mxu0 }
 0x104   :  { %v178_v10 = vadd.f32 %v177_v6, %v1484_v51  ;;  %v179_v11 = vpop.f32.mrb[7].mxu0 }
 0x105   :  { %v180_v12 = vadd.f32 %v179_v11, %v1486_v52  ;;  %879 = vmatprep.mubr.msk.f32.mxu1 %vm317_vm0, %v259_v5 }
 0x106   :  { %441 = vmatmul.mubr.f32.gmra.mrb[4].mxu1 %v258_v9  ;;  %v260_v15 = vmax.f32 %v178_v10, 0.0 }
 0x107   :  { %v261_v13 = vmax.f32 %v180_v12, 0.0  ;;  %v183_v14 = vpop.f32.mrb[8].mxu0 }
 0x108   :  { %v184_v16 = vadd.f32 %v183_v14, %v1484_v51  ;;  %v185_v17 = vpop.f32.mrb[9].mxu0 }
 0x109   :  { %v186_v18 = vadd.f32 %v185_v17, %v1486_v52  ;;  %880 = vmatprep.mubr.msk.f32.mxu1 %vm317_vm0, %v261_v13 }
 0x10a   :  { %446 = vmatmul.mubr.f32.gmra.mrb[6].mxu1 %v260_v15  ;;  %v262_v21 = vmax.f32 %v184_v16, 0.0 }
 0x10b   :  { %v263_v19 = vmax.f32 %v186_v18, 0.0  ;;  %v189_v20 = vpop.f32.mrb[10].mxu0 }
 0x10c   :  { %v190_v22 = vadd.f32 %v189_v20, %v1484_v51  ;;  %v191_v23 = vpop.f32.mrb[11].mxu0 }
 0x10d   :  { %v192_v24 = vadd.f32 %v191_v23, %v1486_v52  ;;  %881 = vmatprep.mubr.msk.f32.mxu1 %vm317_vm0, %v263_v19 }
 0x10e   :  { %451 = vmatmul.mubr.f32.gmra.mrb[8].mxu1 %v262_v21  ;;  %v264_v27 = vmax.f32 %v190_v22, 0.0 }
 0x10f   :  { %v265_v25 = vmax.f32 %v192_v24, 0.0  ;;  %v195_v26 = vpop.f32.mrb[12].mxu0 }
 0x110   :  { %v196_v28 = vadd.f32 %v195_v26, %v1484_v51  ;;  %v197_v29 = vpop.f32.mrb[13].mxu0 }
 0x111   :  { %v198_v30 = vadd.f32 %v197_v29, %v1486_v52  ;;  %882 = vmatprep.mubr.msk.f32.mxu1 %vm317_vm0, %v265_v25 }
 0x112   :  { %456 = vmatmul.mubr.f32.gmra.mrb[10].mxu1 %v264_v27  ;;  %v266_v33 = vmax.f32 %v196_v28, 0.0  ;;  %v1539_v27 = vld [vmem:[%s1647_s4] ss:$0 sm:$0xff] }
 0x113   :  { %v267_v31 = vmax.f32 %v198_v30, 0.0  ;;  %v201_v32 = vpop.f32.mrb[14].mxu0 }
 0x114   :  { %v202_v34 = vadd.f32 %v201_v32, %v1484_v51  ;;  %v203_v35 = vpop.f32.mrb[15].mxu0 }
 0x115   :  { %v204_v36 = vadd.f32 %v203_v35, %v1486_v52  ;;  %883 = vmatprep.mubr.msk.f32.mxu1 %vm317_vm0, %v267_v31 }
 0x116   :  { %461 = vmatmul.mubr.f32.gmra.mrb[12].mxu1 %v266_v33  ;;  %v268_v39 = vmax.f32 %v202_v34, 0.0 }
 0x117   :  { %v269_v37 = vmax.f32 %v204_v36, 0.0  ;;  %v207_v38 = vpop.f32.mrb[16].mxu0 }
 0x118   :  { %v208_v40 = vadd.f32 %v207_v38, %v1484_v51  ;;  %v209_v41 = vpop.f32.mrb[17].mxu0 }
 0x119   :  { %v210_v42 = vadd.f32 %v209_v41, %v1486_v52  ;;  %884 = vmatprep.mubr.msk.f32.mxu1 %vm317_vm0, %v269_v37 }
 0x11a   :  { %466 = vmatmul.mubr.f32.gmra.mrb[14].mxu1 %v268_v39  ;;  %v270_v45 = vmax.f32 %v208_v40, 0.0 }
 0x11b   :  { %v271_v43 = vmax.f32 %v210_v42, 0.0  ;;  %v213_v44 = vpop.f32.mrb[18].mxu0 }
 0x11c   :  { %v214_v46 = vadd.f32 %v213_v44, %v1484_v51  ;;  %v215_v47 = vpop.f32.mrb[19].mxu0 }
 0x11d   :  { %v216_v48 = vadd.f32 %v215_v47, %v1486_v52  ;;  %885 = vmatprep.mubr.msk.f32.mxu1 %vm317_vm0, %v271_v43 }
 0x11e   :  { %471 = vmatmul.mubr.f32.gmra.mrb[16].mxu1 %v270_v45  ;;  %v272_v53 = vmax.f32 %v214_v46, 0.0 }
 0x11f   :  { %v273_v49 = vmax.f32 %v216_v48, 0.0  ;;  %v219_v50 = vpop.f32.mrb[20].mxu0 }
 0x120   :  { %v220_v54 = vadd.f32 %v219_v50, %v1484_v51  ;;  %v221_v55 = vpop.f32.mrb[21].mxu0 }
 0x121   :  { %v222_v56 = vadd.f32 %v221_v55, %v1486_v52  ;;  %886 = vmatprep.mubr.msk.f32.mxu1 %vm317_vm0, %v273_v49 }
 0x122   :  { %476 = vmatmul.mubr.f32.gmra.mrb[18].mxu1 %v272_v53  ;;  %v274_v59 = vmax.f32 %v220_v54, 0.0 }
 0x123   :  { %v275_v57 = vmax.f32 %v222_v56, 0.0  ;;  %v225_v58 = vpop.f32.mrb[22].mxu0 }
 0x124   :  { %v226_v60 = vadd.f32 %v225_v58, %v1484_v51  ;;  %v227_v61 = vpop.f32.mrb[23].mxu0 }
 0x125   :  { %v228_v62 = vadd.f32 %v227_v61, %v1486_v52  ;;  %887 = vmatprep.mubr.msk.f32.mxu1 %vm317_vm0, %v275_v57 }
 0x126   :  { %481 = vmatmul.mubr.f32.gmra.mrb[20].mxu1 %v274_v59  ;;  %v276_v1 = vmax.f32 %v226_v60, 0.0 }
 0x127   :  { %v277_v63 = vmax.f32 %v228_v62, 0.0  ;;  %v231_v0 = vpop.f32.mrb[24].mxu0 }
 0x128   :  { %v232_v2 = vadd.f32 %v231_v0, %v1484_v51  ;;  %v233_v3 = vpop.f32.mrb[25].mxu0 }
 0x129   :  { %v234_v4 = vadd.f32 %v233_v3, %v1486_v52  ;;  %888 = vmatprep.mubr.msk.f32.mxu1 %vm317_vm0, %v277_v63 }
 0x12a   :  { %486 = vmatmul.mubr.f32.gmra.mrb[22].mxu1 %v276_v1  ;;  %v278_v9 = vmax.f32 %v232_v2, 0.0 }
 0x12b   :  { %v279_v5 = vmax.f32 %v234_v4, 0.0  ;;  %v237_v6 = vpop.f32.mrb[26].mxu0 }
 0x12c   :  { %v238_v10 = vadd.f32 %v237_v6, %v1484_v51  ;;  %v239_v11 = vpop.f32.mrb[27].mxu0 }
 0x12d   :  { %v240_v12 = vadd.f32 %v239_v11, %v1486_v52  ;;  %889 = vmatprep.mubr.msk.f32.mxu1 %vm317_vm0, %v279_v5 }
 0x12e   :  { %491 = vmatmul.mubr.f32.gmra.mrb[24].mxu1 %v278_v9  ;;  %v280_v15 = vmax.f32 %v238_v10, 0.0 }
 0x12f   :  { %v281_v13 = vmax.f32 %v240_v12, 0.0  ;;  %v243_v14 = vpop.f32.mrb[28].mxu0 }
 0x130   :  { %v244_v16 = vadd.f32 %v243_v14, %v1484_v51  ;;  %v245_v17 = vpop.f32.mrb[29].mxu0  ;;  %v733_v14 = vld [vmem:[%s1651_s8] sm:$0xff] }
 0x131   :  { %v246_v18 = vadd.f32 %v245_v17, %v1486_v52  ;;  %890 = vmatprep.mubr.msk.f32.mxu1 %vm317_vm0, %v281_v13 }
 0x132   :  { %496 = vmatmul.mubr.f32.gmra.mrb[26].mxu1 %v280_v15  ;;  %v282_v21 = vmax.f32 %v244_v16, 0.0  ;;  %v1172_v15 = vmov 0   ;;  %v1580_v16 = vld [vmem:[%s1649_s6] ss:$0 sm:$0xff] }
 0x133   :  { %v283_v19 = vmax.f32 %v246_v18, 0.0  ;;  %v249_v20 = vpop.f32.mrb[30].mxu0  ;;  %1144 = vset.pattern.permute.xlu0 %v1172_v15 }
 0x134   :  { %v250_v22 = vadd.f32 %v249_v20, %v1484_v51  ;;  %v251_v23 = vpop.f32.mrb[31].mxu0  ;;  %736 = vperm.xlu0 %1144, %v733_v14  }
 0x135   :  { %v252_v24 = vadd.f32 %v251_v23, %v1486_v52  ;;  %891 = vmatprep.mubr.msk.f32.mxu1 %vm317_vm0, %v283_v19 }
 0x136   :  { %501 = vmatmul.mubr.f32.gmra.mrb[28].mxu1 %v282_v21  ;;  %v284_v26 = vmax.f32 %v250_v22, 0.0 }
 0x137   :  { %v285_v25 = vmax.f32 %v252_v24, 0.0 }
 0x139   :  { %892 = vmatprep.mubr.msk.f32.mxu1 %vm317_vm0, %v285_v25 }
 0x13a   :  { %506 = vmatmul.mubr.f32.gmra.mrb[30].mxu1 %v284_v26 }
 0x13b   :  { %1028 = vmatprep.mubr.msk.f32.mxu1 %vm1171_vm2, %v1169_v7 }
 0x1d1   :  { %v432_v28 = vpop.f32.mrb[0].mxu1 }
 0x1d2   :  { %v433_v51 = vadd.f32 %v1539_v27, %v432_v28  ;;  %v434_v29 = vpop.f32.mrb[1].mxu1 }
 0x1d4   :  { %972 = vmatprep.mubr.msk.f32.mxu0 %vm522_vm1, %v433_v51 }
 0x1d5   :  { %v437_v52 = vpop.f32.mrb[2].mxu1 }
 0x1d6   :  { %v438_v30 = vadd.f32 %v1539_v27, %v437_v52  ;;  %v439_v31 = vpop.f32.mrb[3].mxu1 }
 0x1d8   :  { %973 = vmatmul.mubr.msk.f32.vlgmr.msra.gmra.mrb[32].mxu0 %vm522_vm1, %v438_v30 }
 0x1d9   :  { %v442_v32 = vpop.f32.mrb[4].mxu1 }
 0x1da   :  { %v443_v33 = vadd.f32 %v1539_v27, %v442_v32  ;;  %v444_v34 = vpop.f32.mrb[5].mxu1 }
 0x1dc   :  { %975 = vmatprep.mubr.msk.f32.mxu0 %vm522_vm1, %v443_v33 }
 0x1dd   :  { %v447_v35 = vpop.f32.mrb[6].mxu1 }
 0x1de   :  { %v448_v36 = vadd.f32 %v1539_v27, %v447_v35  ;;  %v449_v37 = vpop.f32.mrb[7].mxu1 }
 0x1e0   :  { %976 = vmatmul.mubr.msk.f32.gmra.mrb[34].mxu0 %vm522_vm1, %v448_v36 }
 0x1e1   :  { %v452_v38 = vpop.f32.mrb[8].mxu1 }
 0x1e2   :  { %v453_v39 = vadd.f32 %v1539_v27, %v452_v38  ;;  %v454_v40 = vpop.f32.mrb[9].mxu1 }
 0x1e4   :  { %978 = vmatprep.mubr.msk.f32.mxu0 %vm522_vm1, %v453_v39 }
 0x1e5   :  { %v457_v41 = vpop.f32.mrb[10].mxu1 }
 0x1e6   :  { %v458_v42 = vadd.f32 %v1539_v27, %v457_v41  ;;  %v459_v43 = vpop.f32.mrb[11].mxu1 }
 0x1e8   :  { %979 = vmatmul.mubr.msk.f32.gmra.mrb[36].mxu0 %vm522_vm1, %v458_v42 }
 0x1e9   :  { %v462_v44 = vpop.f32.mrb[12].mxu1 }
 0x1ea   :  { %v463_v45 = vadd.f32 %v1539_v27, %v462_v44  ;;  %v464_v46 = vpop.f32.mrb[13].mxu1 }
 0x1ec   :  { %981 = vmatprep.mubr.msk.f32.mxu0 %vm522_vm1, %v463_v45 }
 0x1ed   :  { %v467_v47 = vpop.f32.mrb[14].mxu1 }
 0x1ee   :  { %v468_v48 = vadd.f32 %v1539_v27, %v467_v47  ;;  %v469_v49 = vpop.f32.mrb[15].mxu1 }
 0x1f0   :  { %982 = vmatmul.mubr.msk.f32.gmra.mrb[38].mxu0 %vm522_vm1, %v468_v48 }
 0x1f1   :  { %v472_v50 = vpop.f32.mrb[16].mxu1 }
 0x1f2   :  { %v473_v53 = vadd.f32 %v1539_v27, %v472_v50  ;;  %v474_v54 = vpop.f32.mrb[17].mxu1 }
 0x1f4   :  { %984 = vmatprep.mubr.msk.f32.mxu0 %vm522_vm1, %v473_v53 }
 0x1f5   :  { %v477_v55 = vpop.f32.mrb[18].mxu1 }
 0x1f6   :  { %v478_v56 = vadd.f32 %v1539_v27, %v477_v55  ;;  %v479_v57 = vpop.f32.mrb[19].mxu1 }
 0x1f8   :  { %985 = vmatmul.mubr.msk.f32.gmra.mrb[40].mxu0 %vm522_vm1, %v478_v56 }
 0x1f9   :  { %v482_v58 = vpop.f32.mrb[20].mxu1 }
 0x1fa   :  { %v483_v59 = vadd.f32 %v1539_v27, %v482_v58  ;;  %v484_v60 = vpop.f32.mrb[21].mxu1 }
 0x1fc   :  { %987 = vmatprep.mubr.msk.f32.mxu0 %vm522_vm1, %v483_v59 }
 0x1fd   :  { %v487_v61 = vpop.f32.mrb[22].mxu1 }
 0x1fe   :  { %v488_v62 = vadd.f32 %v1539_v27, %v487_v61  ;;  %v489_v63 = vpop.f32.mrb[23].mxu1 }
 0x200   :  { %988 = vmatmul.mubr.msk.f32.gmra.mrb[42].mxu0 %vm522_vm1, %v488_v62 }
 0x201   :  { %v492_v0 = vpop.f32.mrb[24].mxu1 }
 0x202   :  { %v493_v1 = vadd.f32 %v1539_v27, %v492_v0  ;;  %v494_v2 = vpop.f32.mrb[25].mxu1 }
 0x204   :  { %990 = vmatprep.mubr.msk.f32.mxu0 %vm522_vm1, %v493_v1 }
 0x205   :  { %v497_v3 = vpop.f32.mrb[26].mxu1 }
 0x206   :  { %v498_v4 = vadd.f32 %v1539_v27, %v497_v3  ;;  %v499_v5 = vpop.f32.mrb[27].mxu1 }
 0x208   :  { %991 = vmatmul.mubr.msk.f32.gmra.mrb[44].mxu0 %vm522_vm1, %v498_v4 }
 0x209   :  { %v502_v6 = vpop.f32.mrb[28].mxu1 }
 0x20a   :  { %v503_v9 = vadd.f32 %v1539_v27, %v502_v6  ;;  %v504_v10 = vpop.f32.mrb[29].mxu1 }
 0x20c   :  { %993 = vmatprep.mubr.msk.f32.mxu0 %vm522_vm1, %v503_v9 }
 0x20d   :  { %v507_v11 = vpop.f32.mrb[30].mxu1 }
 0x20e   :  { %v508_v12 = vadd.f32 %v1539_v27, %v507_v11  ;;  %v509_v13 = vpop.f32.mrb[31].mxu1  ;;  %v732_v11 = vld [vmem:[%s1650_s7] sm:$0xff] }
 0x210   :  { %994 = vmatmul.mubr.msk.f32.gmra.mrb[46].mxu0 %vm522_vm1, %v508_v12  ;;  %v737_v12 = vpop.permute.xlu0 %736 }
 0x2ab   :  { %v974_v17 = vpop.f32.mrb[32].mxu0 }
 0x2ac   :  { %v643_v18 = vadd.f32 %v974_v17, %v1580_v16  ;;  %v637_v19 = vpop.f32.mrb[33].mxu0 }
 0x2ad   :  { %v638_v20 = vadd.f32 %v1580_v16, %v637_v19 }
 0x2ae   :  { %v717_v7 = vmax.f32 %v643_v18, 0.0 }
 0x2af   :  { %v716_v21 = vmax.f32 %v638_v20, 0.0 }
 0x2b1   :  { %v1108_v23 = vpack.c.bf16 %v717_v7, %v716_v21 }
 0x2b3   :  { %v977_v24 = vpop.f32.mrb[34].mxu0  ;;  %1110 = vmatpush3.bf16.xpose.msk.msra.mxu1 %vm1586_vm4, %v1108_v23 }
 0x2b4   :  { %v653_v25 = vadd.f32 %v977_v24, %v1580_v16  ;;  %v647_v26 = vpop.f32.mrb[35].mxu0  ;;  %1111 = vmatprep.subr.bf16.mxu1 %v1170_v8 }
 0x2b5   :  { %v648_v27 = vadd.f32 %v1580_v16, %v647_v26 }
 0x2b6   :  { %v719_v28 = vmax.f32 %v653_v25, 0.0 }
 0x2b7   :  { %v718_v51 = vmax.f32 %v648_v27, 0.0 }
 0x2b9   :  { %v1112_v29 = vpack.c.bf16 %v719_v28, %v718_v51 }
 0x2bb   :  { %v980_v52 = vpop.f32.mrb[36].mxu0  ;;  %1114 = vmatpush3.bf16.xpose.msk.msra.mxu1 %vm1586_vm4, %v1112_v29 }
 0x2bc   :  { %v663_v30 = vadd.f32 %v980_v52, %v1580_v16  ;;  %v657_v31 = vpop.f32.mrb[37].mxu0  ;;  %1115 = vmatprep.subr.bf16.mxu1 %v1170_v8 }
 0x2bd   :  { %v658_v32 = vadd.f32 %v1580_v16, %v657_v31 }
 0x2be   :  { %v721_v33 = vmax.f32 %v663_v30, 0.0 }
 0x2bf   :  { %v720_v34 = vmax.f32 %v658_v32, 0.0 }
 0x2c1   :  { %v1116_v35 = vpack.c.bf16 %v721_v33, %v720_v34 }
 0x2c3   :  { %v983_v36 = vpop.f32.mrb[38].mxu0  ;;  %1118 = vmatpush3.bf16.xpose.msk.msra.mxu1 %vm1586_vm4, %v1116_v35 }
 0x2c4   :  { %v673_v37 = vadd.f32 %v983_v36, %v1580_v16  ;;  %v667_v38 = vpop.f32.mrb[39].mxu0  ;;  %1119 = vmatprep.subr.bf16.mxu1 %v1170_v8 }
 0x2c5   :  { %v668_v39 = vadd.f32 %v1580_v16, %v667_v38 }
 0x2c6   :  { %v723_v40 = vmax.f32 %v673_v37, 0.0 }
 0x2c7   :  { %v722_v41 = vmax.f32 %v668_v39, 0.0 }
 0x2c9   :  { %v1120_v42 = vpack.c.bf16 %v723_v40, %v722_v41 }
 0x2cb   :  { %v986_v43 = vpop.f32.mrb[40].mxu0  ;;  %1122 = vmatpush3.bf16.xpose.msk.msra.mxu1 %vm1586_vm4, %v1120_v42 }
 0x2cc   :  { %v683_v44 = vadd.f32 %v986_v43, %v1580_v16  ;;  %v677_v45 = vpop.f32.mrb[41].mxu0  ;;  %1123 = vmatprep.subr.bf16.mxu1 %v1170_v8 }
 0x2cd   :  { %v678_v46 = vadd.f32 %v1580_v16, %v677_v45 }
 0x2ce   :  { %v725_v47 = vmax.f32 %v683_v44, 0.0 }
 0x2cf   :  { %v724_v48 = vmax.f32 %v678_v46, 0.0 }
 0x2d1   :  { %v1124_v49 = vpack.c.bf16 %v725_v47, %v724_v48 }
 0x2d3   :  { %v989_v50 = vpop.f32.mrb[42].mxu0  ;;  %1126 = vmatpush3.bf16.xpose.msk.msra.mxu1 %vm1586_vm4, %v1124_v49 }
 0x2d4   :  { %v693_v53 = vadd.f32 %v989_v50, %v1580_v16  ;;  %v687_v54 = vpop.f32.mrb[43].mxu0  ;;  %1127 = vmatprep.subr.bf16.mxu1 %v1170_v8 }
 0x2d5   :  { %v688_v55 = vadd.f32 %v1580_v16, %v687_v54 }
 0x2d6   :  { %v727_v56 = vmax.f32 %v693_v53, 0.0 }
 0x2d7   :  { %v726_v57 = vmax.f32 %v688_v55, 0.0 }
 0x2d9   :  { %v1128_v58 = vpack.c.bf16 %v727_v56, %v726_v57 }
 0x2db   :  { %v992_v59 = vpop.f32.mrb[44].mxu0  ;;  %1130 = vmatpush3.bf16.xpose.msk.msra.mxu1 %vm1586_vm4, %v1128_v58 }
 0x2dc   :  { %v703_v60 = vadd.f32 %v992_v59, %v1580_v16  ;;  %v697_v61 = vpop.f32.mrb[45].mxu0  ;;  %1131 = vmatprep.subr.bf16.mxu1 %v1170_v8 }
 0x2dd   :  { %v698_v62 = vadd.f32 %v1580_v16, %v697_v61 }
 0x2de   :  { %v729_v63 = vmax.f32 %v703_v60, 0.0 }
 0x2df   :  { %v728_v0 = vmax.f32 %v698_v62, 0.0 }
 0x2e1   :  { %v1132_v1 = vpack.c.bf16 %v729_v63, %v728_v0 }
 0x2e3   :  { %v995_v2 = vpop.f32.mrb[46].mxu0  ;;  %1134 = vmatpush3.bf16.xpose.msk.msra.mxu1 %vm1586_vm4, %v1132_v1 }
 0x2e4   :  { %v713_v3 = vadd.f32 %v995_v2, %v1580_v16  ;;  %v707_v4 = vpop.f32.mrb[47].mxu0  ;;  %1135 = vmatprep.subr.bf16.mxu1 %v1170_v8 }
 0x2e5   :  { %v708_v5 = vadd.f32 %v1580_v16, %v707_v4 }
 0x2e6   :  { %v731_v6 = vmax.f32 %v713_v3, 0.0 }
 0x2e7   :  { %v730_v9 = vmax.f32 %v708_v5, 0.0 }
 0x2e9   :  { %v1136_v10 = vpack.c.bf16 %v731_v6, %v730_v9 }
 0x2eb   :  { %1138 = vmatpush3.bf16.xpose.msk.msra.mxu1 %vm1586_vm4, %v1136_v10 }
 0x2f2   :  { %1029 = vmatmul.mubr.msk.f32.vlgmr.msra.gmra.mrb[32].mxu1 %vm739_vm3, %v732_v11 }
 0x3c5   :  { %v857_v13 = vpop.f32.mrb[32].mxu1 }
 0x3c6   :  { %v858_v14 = vadd.f32 %v857_v13, %v737_v12  ;;  %v1030_v8 = vpop.f32.mrb[33].mxu1 }
 0x3c8   :  { %861 = vst [vmem:[#allocation2] sm:$0xff] %v858_v14 }
 0x3c9   :  { %1156 = shalt.err (!%p1153_p4)
}
 0x3ca   :  { %s1157_s7 = scalar_lea.hbm %s1652_s9, 128 }
 0x3cb   :  { %p1158_p5 = scmp.ne.s32.totalorder %s1652_s9, %s1157_s7  ;;  %p1161_p6 = scmp.lt.u32.totalorder %s1157_s7, %s1652_s9 }
 0x3cd   :  { %p1163_p7 = pnand %p1161_p6, %p1158_p5 }
 0x3cf   :  { %1166 = shalt.err (!%p1163_p7)
}
 0x3d0   :  { %871 = dma.vmem_to_hbm [thread:$0]  %s869_s14, 128, %s1652_s9, [#allocation3]  }
 0x3d1   :  { %1167 = dma.done.wait [#allocation3], 128  }
 0x3d2   :  { %1168 = vsyncadd [#allocation3], 4294967168 }
 0x3d3   :  { %875 = vsyncpa [#allocation3], 1 }

</bundles_post_ra>
